<compile_context>
chip_gen: v7x
topology: tpu7x:2x2x1
jax: 0.10.0
libtpu: 0.0.40
codegen_flags: <defaults>
</compile_context>

<pallas_src>
import functools

import jax
import jax.numpy as jnp
from jax.experimental import pallas as pl
from jax.experimental.pallas import tpu as pltpu


def _round_up(a: int, b: int) -> int:
    return ((a + b - 1) // b) * b


def _bf16_terms(v, n_terms):
    # Split an f32 array into n bf16 terms whose f32 sum approximates v.
    # n=2 keeps ~16 mantissa bits, n=3 ~24 bits (f32-equivalent). This lets the
    # segmented sums run as *single-pass* DEFAULT-precision bf16 MXU matmuls.
    terms = []
    rem = v
    for i in range(n_terms):
        t = rem.astype(jnp.bfloat16)
        terms.append(t)
        if i + 1 < n_terms:
            rem = rem - t.astype(jnp.float32)
    return terms


def _seg_sum(v, blk_bf16, n_terms):
    # Per-segment sums of v, broadcast across each segment's lanes: v @ blk.
    acc = None
    for t in _bf16_terms(v, n_terms):
        p = jnp.dot(t, blk_bf16, preferred_element_type=jnp.float32)
        acc = p if acc is None else acc + p
    return acc


def _encoder_norm_kernel_packed(x_ref, blk_ref, alpha_ref, bias_ref, o_ref, *,
                                eps, d):
    # x_ref: (TILE_ROWS, W) with W = k*d; every physical row holds k independent
    # logical rows (lane segments of size d). blk_ref: constant (W, W) bf16
    # block-diagonal 0/1 matrix; x @ blk broadcasts each segment's sum to all of
    # that segment's lanes, keeping everything lane-dense on the otherwise idle MXU.
    x = x_ref[...].astype(jnp.float32)
    blk = blk_ref[...]
    # Two-pass statistics (no cancellation); mean path gets 3 bf16 terms, the
    # non-negative squared-deviation sum needs only 2.
    mean = _seg_sum(x, blk, 3) * (1.0 / d)
    c = x - mean
    var = _seg_sum(c * c, blk, 2) * (1.0 / (d - 1))
    std = jnp.sqrt(var)
    scale = alpha_ref[0] * pl.reciprocal(std + eps, approx=False)
    o_ref[...] = (c * scale + bias_ref[0]).astype(o_ref.dtype)


def _encoder_norm_kernel(x_ref, alpha_ref, bias_ref, o_ref, *, eps, d):
    # Plain lane-dense path (W == d); per-row reductions on the XLU.
    x = x_ref[...].astype(jnp.float32)
    mean = jnp.sum(x, axis=-1, keepdims=True) * (1.0 / d)
    c = x - mean
    var = jnp.sum(c * c, axis=-1, keepdims=True) * (1.0 / (d - 1))
    std = jnp.sqrt(var)
    scale = alpha_ref[0] * pl.reciprocal(std + eps, approx=False)
    o_ref[...] = (c * scale + bias_ref[0]).astype(o_ref.dtype)


@functools.partial(jax.jit, static_argnames=("eps", "tile_rows"))
def encoder_forward(x, mask, alpha, bias, *, eps=1e-6, tile_rows=None):
    """Encoder forward: (no layers) -> LayerNormalization(x). `mask` is unused."""
    # TODO(synk): the per-layer EncoderBlock class is not defined in the reference
    # snippet, so the layer stack is treated as empty and `mask` is unused.
    del mask
    B, S, D = x.shape
    assert D > 1, "unbiased (ddof=1) std requires d_model > 1"
    rows = B * S
    itemsize = jnp.dtype(x.dtype).itemsize

    # Lane packing: fold k logical rows into one 128-lane physical row, but only
    # when it requires no data movement (D divides 128 and rows % k == 0);
    # otherwise fall back to W = D (copy-free).
    # TODO(synk): D that is neither a divisor nor a multiple of 128 (e.g. 96) still
    # takes the masked-store fallback path; a generalized lcm-based packing would
    # need an in-block lane pad.
    if D < 128 and 128 % D == 0 and rows % (128 // D) == 0:
        k = 128 // D
    else:
        k = 1
    W = k * D
    packed = k > 1
    phys_rows = rows // k

    # Generation-aware VMEM budget (v7x: 64 MiB physical vs 128 MiB on v5e/v6e).
    try:
        info = pltpu.get_tpu_info()
        vmem_cap = getattr(info, "vmem_capacity_bytes", None) or 64 * 1024 * 1024
    except Exception:  # conservative (v7x-safe) fallback
        vmem_cap = 64 * 1024 * 1024
    vmem_limit = max(32 * 1024 * 1024, min(vmem_cap // 2, 100 * 1024 * 1024))

    # Sublane granularity follows the dtype's packing (8 f32, 16 bf16, 32 int8/fp8).
    sub = {4: 8, 2: 16, 1: 32}.get(itemsize, 8)

    if tile_rows is None:
        # Row cap: ~1 MiB tiles; 2048 rows on v5e/v6e, 1024 on v7x's smaller VMEM.
        cap = 2048 if vmem_cap >= 96 * 1024 * 1024 else 1024
        # Double-buffered input+output tiles plus f32 temporaries ~ 8x tile bytes.
        budget_rows = (vmem_limit // 8) // max(1, W * itemsize)
        tr = min(cap, max(sub, budget_rows))
        # Target >= 16 grid steps (fill/drain hidden, both v7x TCs fed) but never
        # shrink tiles below 512 rows for that; only genuinely tiny inputs go lower.
        tr = min(tr, max(512, _round_up(pl.cdiv(phys_rows, 16), sub)))
        tr = min(tr, _round_up(phys_rows, sub))
        tile_rows = max(sub, (tr // sub) * sub)

    # Copy-free views: contiguous reshapes only (no pad, no slice).
    x2 = x.reshape(phys_rows, W)
    grid = (pl.cdiv(phys_rows, tile_rows),)

    in_specs = [pl.BlockSpec((tile_rows, W), lambda i: (i, 0))]
    operands = [x2]
    if packed:
        # Constant block-diagonal segment matrix, DMA'd once (constant block index).
        seg = jnp.arange(W, dtype=jnp.int32) // D
        blk = (seg[:, None] == seg[None, :]).astype(jnp.bfloat16)
        in_specs.append(pl.BlockSpec((W, W), lambda i: (0, 0)))
        operands.append(blk)
        kern = functools.partial(_encoder_norm_kernel_packed, eps=eps, d=D)
    else:
        kern = functools.partial(_encoder_norm_kernel, eps=eps, d=D)
    in_specs += [pl.BlockSpec(memory_space=pltpu.MemorySpace.SMEM)] * 2
    operands += [alpha, bias]

    out = pl.pallas_call(
        kern,
        out_shape=jax.ShapeDtypeStruct((phys_rows, W), x.dtype),
        grid=grid,
        in_specs=in_specs,
        out_specs=pl.BlockSpec((tile_rows, W), lambda i: (i, 0)),
        compiler_params=pltpu.CompilerParams(
            dimension_semantics=("parallel",),
            vmem_limit_bytes=int(vmem_limit),
        ),
    )(*operands)

    return out.reshape(B, S, D)


def _reference(x, alpha, bias, eps=1e-6):
    xf = x.astype(jnp.float32)
    mean = jnp.mean(xf, axis=-1, keepdims=True)
    var = jnp.sum((xf - mean) ** 2, axis=-1, keepdims=True) / (xf.shape[-1] - 1)
    std = jnp.sqrt(var)
    return (alpha[0] * (xf - mean) / (std + eps) + bias[0]).astype(x.dtype)


if __name__ == "__main__":
    key = jax.random.PRNGKey(0)

    # Primary shape implied by the module: batch=2, seq=8, d_model=32.
    cases = [
        # (B, S, D, alpha, bias) -- first case uses the module's init parameters.
        (2, 8, 32, 1.0, 0.0),      # packed lane-dense path (k=4), single block
        (3, 5, 32, 1.5, -0.25),    # rows % k != 0 -> copy-free fallback, ragged block
        (2, 8, 128, 0.75, 0.5),    # plain path, D a multiple of 128
        (4, 520, 32, 1.25, 0.1),   # packed, multi-step grid with ragged last block
    ]
    for i, (B, S, D, a, b) in enumerate(cases):
        kx = jax.random.fold_in(key, i)
        x = jax.random.normal(kx, (B, S, D), dtype=jnp.float32)
        mask = jnp.ones((B, 1, 1, S), dtype=jnp.float32)  # unused (empty layer stack)
        alpha = jnp.full((1,), a, dtype=jnp.float32)
        bias = jnp.full((1,), b, dtype=jnp.float32)

        out = jax.block_until_ready(encoder_forward(x, mask, alpha, bias))
        ref = _reference(x, alpha, bias)
        assert out.shape == (B, S, D)
        assert jnp.allclose(out, ref, atol=1e-5, rtol=1e-5), f"mismatch at {(B, S, D)}"

    print("KERNEL_OK")
</pallas_src>

<mosaic_0001>
module attributes {stable_mosaic.version = 11 : i64} {
  func.func @_encoder_norm_kernel_packed(%arg0: i32, %arg1: memref<8x128xf32, #tpu.memory_space<vmem>>, %arg2: memref<128x128xbf16, #tpu.memory_space<vmem>>, %arg3: memref<1xf32, #tpu.memory_space<smem>>, %arg4: memref<1xf32, #tpu.memory_space<smem>>, %arg5: memref<8x128xf32, #tpu.memory_space<vmem>>) attributes {dimension_semantics = [#tpu.dimension_semantics<parallel>], iteration_bounds = array<i64: 1>, scalar_prefetch = 0 : i64, scratch_operands = 0 : i64, tpu.core_type = #tpu.core_type<tc>, window_params = [{transform_indices = @transform_0, window_bounds = array<i64: 8, 128>}, {pipeline_mode = #tpu.pipeline_mode<synchronous>, transform_indices = @transform_1, window_bounds = array<i64: 128, 128>}, {transform_indices = @transform_2, window_bounds = array<i64: 1>}, {transform_indices = @transform_3, window_bounds = array<i64: 1>}, {transform_indices = @transform_4, window_bounds = array<i64: 8, 128>}]} {
    %c0 = arith.constant 0 : index
    %c0_0 = arith.constant 0 : index
    %0 = vector.load %arg1[%c0, %c0_0] : memref<8x128xf32, #tpu.memory_space<vmem>>, vector<8x128xf32>
    %c0_1 = arith.constant 0 : index
    %c0_2 = arith.constant 0 : index
    %1 = vector.load %arg2[%c0_1, %c0_2] : memref<128x128xbf16, #tpu.memory_space<vmem>>, vector<128x128xbf16>
    %2 = arith.truncf %0 : vector<8x128xf32> to vector<8x128xbf16>
    %3 = arith.extf %2 : vector<8x128xbf16> to vector<8x128xf32>
    %4 = arith.subf %0, %3 : vector<8x128xf32>
    %5 = arith.truncf %4 : vector<8x128xf32> to vector<8x128xbf16>
    %6 = arith.extf %5 : vector<8x128xbf16> to vector<8x128xf32>
    %7 = arith.subf %4, %6 : vector<8x128xf32>
    %8 = arith.truncf %7 : vector<8x128xf32> to vector<8x128xbf16>
    %cst = arith.constant dense<0.000000e+00> : vector<8x128xf32>
    %9 = tpu.matmul %2, %1, %cst {dimension_numbers = #tpu.dot_dimension_numbers<[1], [0], [0], [1], [0, 0, 1, 1], [], []>} : vector<8x128xbf16>, vector<128x128xbf16>, vector<8x128xf32> -> vector<8x128xf32>
    %cst_3 = arith.constant dense<0.000000e+00> : vector<8x128xf32>
    %10 = tpu.matmul %5, %1, %cst_3 {dimension_numbers = #tpu.dot_dimension_numbers<[1], [0], [0], [1], [0, 0, 1, 1], [], []>} : vector<8x128xbf16>, vector<128x128xbf16>, vector<8x128xf32> -> vector<8x128xf32>
    %11 = arith.addf %9, %10 : vector<8x128xf32>
    %cst_4 = arith.constant dense<0.000000e+00> : vector<8x128xf32>
    %12 = tpu.matmul %8, %1, %cst_4 {dimension_numbers = #tpu.dot_dimension_numbers<[1], [0], [0], [1], [0, 0, 1, 1], [], []>} : vector<8x128xbf16>, vector<128x128xbf16>, vector<8x128xf32> -> vector<8x128xf32>
    %13 = arith.addf %11, %12 : vector<8x128xf32>
    %cst_5 = arith.constant 3.125000e-02 : f32
    %14 = vector.broadcast %cst_5 : f32 to vector<8x128xf32>
    %15 = arith.mulf %13, %14 : vector<8x128xf32>
    %16 = arith.subf %0, %15 : vector<8x128xf32>
    %17 = arith.mulf %16, %16 : vector<8x128xf32>
    %18 = arith.truncf %17 : vector<8x128xf32> to vector<8x128xbf16>
    %19 = arith.extf %18 : vector<8x128xbf16> to vector<8x128xf32>
    %20 = arith.subf %17, %19 : vector<8x128xf32>
    %21 = arith.truncf %20 : vector<8x128xf32> to vector<8x128xbf16>
    %cst_6 = arith.constant dense<0.000000e+00> : vector<8x128xf32>
    %22 = tpu.matmul %18, %1, %cst_6 {dimension_numbers = #tpu.dot_dimension_numbers<[1], [0], [0], [1], [0, 0, 1, 1], [], []>} : vector<8x128xbf16>, vector<128x128xbf16>, vector<8x128xf32> -> vector<8x128xf32>
    %cst_7 = arith.constant dense<0.000000e+00> : vector<8x128xf32>
    %23 = tpu.matmul %21, %1, %cst_7 {dimension_numbers = #tpu.dot_dimension_numbers<[1], [0], [0], [1], [0, 0, 1, 1], [], []>} : vector<8x128xbf16>, vector<128x128xbf16>, vector<8x128xf32> -> vector<8x128xf32>
    %24 = arith.addf %22, %23 : vector<8x128xf32>
    %cst_8 = arith.constant 0.0322580636 : f32
    %25 = vector.broadcast %cst_8 : f32 to vector<8x128xf32>
    %26 = arith.mulf %24, %25 : vector<8x128xf32>
    %27 = math.sqrt %26 : vector<8x128xf32>
    %c0_9 = arith.constant 0 : index
    %28 = memref.load %arg3[%c0_9] : memref<1xf32, #tpu.memory_space<smem>>
    %cst_10 = arith.constant 9.99999997E-7 : f32
    %29 = vector.broadcast %cst_10 : f32 to vector<8x128xf32>
    %30 = arith.addf %27, %29 : vector<8x128xf32>
    %31 = tpu.reciprocal %30 : vector<8x128xf32> -> vector<8x128xf32>
    %32 = vector.broadcast %28 : f32 to vector<8x128xf32>
    %33 = arith.mulf %32, %31 : vector<8x128xf32>
    %34 = arith.mulf %16, %33 : vector<8x128xf32>
    %c0_11 = arith.constant 0 : index
    %35 = memref.load %arg4[%c0_11] : memref<1xf32, #tpu.memory_space<smem>>
    %36 = vector.broadcast %35 : f32 to vector<8x128xf32>
    %37 = arith.addf %34, %36 : vector<8x128xf32>
    %c0_12 = arith.constant 0 : index
    %c0_13 = arith.constant 0 : index
    %38 = vector.load %arg5[%c0_12, %c0_13] : memref<8x128xf32, #tpu.memory_space<vmem>>, vector<8x128xf32>
    tpu.vector_store %arg5[%c0_12, %c0_13], %37 {strides = array<i32>} : memref<8x128xf32, #tpu.memory_space<vmem>>, vector<8x128xf32>,
    return
  }
  func.func @transform_0(%arg0: i32) -> (i32, i32) {
    %c0_i32 = arith.constant 0 : i32
    %c0_i32_0 = arith.constant 0 : i32
    return %arg0, %c0_i32 : i32, i32
  }
  func.func @transform_1(%arg0: i32) -> (i32, i32) {
    %c0_i32 = arith.constant 0 : i32
    %c0_i32_0 = arith.constant 0 : i32
    %c0_i32_1 = arith.constant 0 : i32
    return %c0_i32, %c0_i32_0 : i32, i32
  }
  func.func @transform_2(%arg0: i32) -> i32 {
    %c0_i32 = arith.constant 0 : i32
    %c0_i32_0 = arith.constant 0 : i32
    return %c0_i32 : i32
  }
  func.func @transform_3(%arg0: i32) -> i32 {
    %c0_i32 = arith.constant 0 : i32
    %c0_i32_0 = arith.constant 0 : i32
    return %c0_i32 : i32
  }
  func.func @transform_4(%arg0: i32) -> (i32, i32) {
    %c0_i32 = arith.constant 0 : i32
    %c0_i32_0 = arith.constant 0 : i32
    return %arg0, %c0_i32 : i32, i32
  }
}

</mosaic_0001>

<bundles_post_ra>
// kernel: encoder_forward.1
= control target key start
LH: loop header
LB: loop body
LE: loop exit
PB: predicated region body
PF: predicated region fallthrough
CT: control target
= control target key end

     0   :  { %v536_v1 = vmov 0.0   ;;  %vm537_vm0 = vmmov 0   ;;  %s711_s0 = inlined_call_operand.vmem [shape: f32[4,128], index: 0, kind: input, shape index: {}]   ;;  %s712_s1 = inlined_call_operand.vmem [shape: bf16[128,128], index: 1, kind: input, shape index: {}]   ;;  %s713_s2 = inlined_call_operand.<no memory space> [shape: f32[1], index: 2, kind: input, shape index: {}]   ;;  %s714_s3 = inlined_call_operand.<no memory space> [shape: f32[1], index: 3, kind: input, shape index: {}]   ;;  %s715_s4 = inlined_call_operand.vmem [shape: f32[4,128], index: 4, kind: output, shape index: {}]  }
   0x1   :  { %v566_v0 = vld [vmem:[%s712_s1] sm:$0xff]   ;;  %410 = vmatprep.subr.bf16.mxu0 %v536_v1  ;;  %470 = vmatprep.subr.bf16.mxu1 %v536_v1  ;;  %v574_v2 = vld [vmem:[%s712_s1 + $0x8] sm:$0xff]   ;;  %v587_v3 = vld [vmem:[%s712_s1 + $0x10] sm:$0xff]   ;;  %v311_v39 = vstv %s713_s2 }
   0x2   :  { %411 = vmatpush3.bf16.msra.mxu0 %v566_v0  ;;  %426 = vmatprep.mubr.msk.bf16.mxu0 %vm537_vm0, %v536_v1  ;;  %v596_v4 = vld [vmem:[%s712_s1 + $0x18] sm:$0xff]   ;;  %v605_v5 = vld [vmem:[%s712_s1 + $0x20] sm:$0xff]   ;;  %v621_v8 = vld [vmem:[%s712_s1 + $0x28] sm:$0xff]   ;;  %v315_v42 = vstv %s714_s3 }
   0x3   :  { %412 = vmatprep.subr.bf16.mxu0 %v536_v1  ;;  %471 = vmatpush3.bf16.msra.mxu1 %v566_v0  ;;  %v610_v6 = vld [vmem:[%s711_s0] sm:$0xff]  ;;  %v630_v10 = vld [vmem:[%s712_s1 + $0x30] sm:$0xff]   ;;  %v640_v12 = vld [vmem:[%s712_s1 + $0x38] sm:$0xff]  }
   0x4   :  { %472 = vmatprep.subr.bf16.mxu1 %v536_v1  ;;  %486 = vmatprep.mubr.msk.bf16.mxu1 %vm537_vm0, %v536_v1  ;;  %v37_v7 = vpack.c.bf16 %v610_v6, %v610_v6 }
   0x6   :  { %413 = vmatpush3.bf16.msra.mxu0 %v574_v2  ;;  %v38_v9 = vunpack.c.l.bf16 %v37_v7 }
   0x7   :  { %414 = vmatprep.subr.bf16.mxu0 %v536_v1  ;;  %473 = vmatpush3.bf16.msra.mxu1 %v574_v2 }
   0x8   :  { %474 = vmatprep.subr.bf16.mxu1 %v536_v1  ;;  %v39_v11 = vsub.f32 %v610_v6, %v38_v9 }
   0xa   :  { %415 = vmatpush3.bf16.msra.mxu0 %v587_v3  ;;  %v40_v13 = vpack.c.bf16 %v39_v11, %v39_v11 }
   0xb   :  { %416 = vmatprep.subr.bf16.mxu0 %v536_v1  ;;  %475 = vmatpush3.bf16.msra.mxu1 %v587_v3 }
   0xc   :  { %476 = vmatprep.subr.bf16.mxu1 %v536_v1  ;;  %v41_v14 = vunpack.c.l.bf16 %v40_v13 }
   0xe   :  { %417 = vmatpush3.bf16.msra.mxu0 %v596_v4  ;;  %v42_v15 = vsub.f32 %v39_v11, %v41_v14 }
   0xf   :  { %418 = vmatprep.subr.bf16.mxu0 %v536_v1  ;;  %477 = vmatpush3.bf16.msra.mxu1 %v596_v4 }
  0x10   :  { %478 = vmatprep.subr.bf16.mxu1 %v536_v1  ;;  %v43_v16 = vpack.c.bf16 %v42_v15, %v42_v15 }
  0x12   :  { %419 = vmatpush3.bf16.msra.mxu0 %v605_v5 }
  0x13   :  { %420 = vmatprep.subr.bf16.mxu0 %v536_v1  ;;  %479 = vmatpush3.bf16.msra.mxu1 %v605_v5 }
  0x14   :  { %480 = vmatprep.subr.bf16.mxu1 %v536_v1 }
  0x16   :  { %421 = vmatpush3.bf16.msra.mxu0 %v621_v8 }
  0x17   :  { %422 = vmatprep.subr.bf16.mxu0 %v536_v1  ;;  %481 = vmatpush3.bf16.msra.mxu1 %v621_v8 }
  0x18   :  { %482 = vmatprep.subr.bf16.mxu1 %v536_v1 }
  0x1a   :  { %423 = vmatpush3.bf16.msra.mxu0 %v630_v10 }
  0x1b   :  { %424 = vmatprep.subr.bf16.mxu0 %v536_v1  ;;  %483 = vmatpush3.bf16.msra.mxu1 %v630_v10 }
  0x1c   :  { %484 = vmatprep.subr.bf16.mxu1 %v536_v1 }
  0x1e   :  { %425 = vmatpush3.bf16.msra.mxu0 %v640_v12 }
  0x1f   :  { %430 = vmatprep.subr.bf16.mxu0 %v536_v1  ;;  %485 = vmatpush3.bf16.msra.mxu1 %v640_v12 }
  0x20   :  { %490 = vmatprep.subr.bf16.mxu1 %v536_v1 }
  0x21   :  { %427 = vmatmul.mubr.bf16.vlgmr.msra.gmra.mrb[0].mxu0 %v40_v13 }
  0x22   :  { %431 = vmatpush3.bf16.msra.mxu0 %v566_v0  ;;  %446 = vmatprep.mubr.msk.bf16.mxu0 %vm537_vm0, %v536_v1 }
  0x23   :  { %432 = vmatprep.subr.bf16.mxu0 %v536_v1 }
  0x26   :  { %433 = vmatpush3.bf16.msra.mxu0 %v574_v2 }
  0x27   :  { %434 = vmatprep.subr.bf16.mxu0 %v536_v1 }
  0x2a   :  { %435 = vmatpush3.bf16.msra.mxu0 %v587_v3 }
  0x2b   :  { %436 = vmatprep.subr.bf16.mxu0 %v536_v1 }
  0x2e   :  { %437 = vmatpush3.bf16.msra.mxu0 %v596_v4 }
  0x2f   :  { %438 = vmatprep.subr.bf16.mxu0 %v536_v1 }
  0x32   :  { %439 = vmatpush3.bf16.msra.mxu0 %v605_v5 }
  0x33   :  { %440 = vmatprep.subr.bf16.mxu0 %v536_v1 }
  0x36   :  { %441 = vmatpush3.bf16.msra.mxu0 %v621_v8 }
  0x37   :  { %442 = vmatprep.subr.bf16.mxu0 %v536_v1 }
  0x3a   :  { %443 = vmatpush3.bf16.msra.mxu0 %v630_v10 }
  0x3b   :  { %444 = vmatprep.subr.bf16.mxu0 %v536_v1 }
  0x3e   :  { %445 = vmatpush3.bf16.msra.mxu0 %v640_v12 }
  0x3f   :  { %450 = vmatprep.subr.bf16.mxu0 %v536_v1 }
  0x41   :  { %447 = vmatmul.mubr.bf16.vlgmr.msra.gmra.mrb[0].mxu0 %v37_v7 }
  0x42   :  { %451 = vmatpush3.bf16.msra.mxu0 %v566_v0  ;;  %466 = vmatprep.mubr.msk.bf16.mxu0 %vm537_vm0, %v536_v1 }
  0x43   :  { %452 = vmatprep.subr.bf16.mxu0 %v536_v1 }
  0x46   :  { %453 = vmatpush3.bf16.msra.mxu0 %v574_v2 }
  0x47   :  { %454 = vmatprep.subr.bf16.mxu0 %v536_v1 }
  0x4a   :  { %455 = vmatpush3.bf16.msra.mxu0 %v587_v3 }
  0x4b   :  { %456 = vmatprep.subr.bf16.mxu0 %v536_v1 }
  0x4e   :  { %457 = vmatpush3.bf16.msra.mxu0 %v596_v4 }
  0x4f   :  { %458 = vmatprep.subr.bf16.mxu0 %v536_v1 }
  0x52   :  { %459 = vmatpush3.bf16.msra.mxu0 %v605_v5 }
  0x53   :  { %460 = vmatprep.subr.bf16.mxu0 %v536_v1 }
  0x56   :  { %461 = vmatpush3.bf16.msra.mxu0 %v621_v8 }
  0x57   :  { %462 = vmatprep.subr.bf16.mxu0 %v536_v1 }
  0x5a   :  { %463 = vmatpush3.bf16.msra.mxu0 %v630_v10 }
  0x5b   :  { %464 = vmatprep.subr.bf16.mxu0 %v536_v1 }
  0x5e   :  { %465 = vmatpush3.bf16.msra.mxu0 %v640_v12 }
  0x61   :  { %467 = vmatmul.mubr.bf16.vlgmr.msra.gmra.mrb[0].mxu0 %v43_v16 }
 0x134   :  { %v206_v17 = vpop.f32.mrb[0].mxu0 }
 0x135   :  { %v213_v18 = vmul.f32 0.03125, %v206_v17  ;;  %v468_v19 = vpop.f32.mrb[1].mxu0 }
 0x136   :  { %v209_v20 = vpop.f32.mrb[2].mxu0 }
 0x137   :  { %v214_v21 = vsub.f32 %v610_v6, %v213_v18  ;;  %v469_v22 = vpop.f32.mrb[3].mxu0 }
 0x139   :  { %v215_v23 = vmul.f32 %v214_v21, %v214_v21 }
 0x13b   :  { %v216_v24 = vpack.c.bf16 %v215_v23, %v215_v23 }
 0x13d   :  { %v217_v25 = vunpack.c.l.bf16 %v216_v24 }
 0x13f   :  { %v218_v26 = vsub.f32 %v215_v23, %v217_v25 }
 0x141   :  { %v219_v27 = vpack.c.bf16 %v218_v26, %v218_v26 }
 0x143   :  { %487 = vmatmul.mubr.bf16.vlgmr.msra.gmra.mrb[0].mxu1 %v219_v27 }
 0x144   :  { %491 = vmatpush3.bf16.msra.mxu1 %v566_v0  ;;  %506 = vmatprep.mubr.msk.bf16.mxu1 %vm537_vm0, %v536_v1 }
 0x145   :  { %492 = vmatprep.subr.bf16.mxu1 %v536_v1 }
 0x148   :  { %493 = vmatpush3.bf16.msra.mxu1 %v574_v2 }
 0x149   :  { %494 = vmatprep.subr.bf16.mxu1 %v536_v1 }
 0x14c   :  { %495 = vmatpush3.bf16.msra.mxu1 %v587_v3 }
 0x14d   :  { %496 = vmatprep.subr.bf16.mxu1 %v536_v1 }
 0x150   :  { %497 = vmatpush3.bf16.msra.mxu1 %v596_v4 }
 0x151   :  { %498 = vmatprep.subr.bf16.mxu1 %v536_v1 }
 0x154   :  { %499 = vmatpush3.bf16.msra.mxu1 %v605_v5 }
 0x155   :  { %500 = vmatprep.subr.bf16.mxu1 %v536_v1 }
 0x158   :  { %501 = vmatpush3.bf16.msra.mxu1 %v621_v8 }
 0x159   :  { %502 = vmatprep.subr.bf16.mxu1 %v536_v1 }
 0x15c   :  { %503 = vmatpush3.bf16.msra.mxu1 %v630_v10 }
 0x15d   :  { %504 = vmatprep.subr.bf16.mxu1 %v536_v1 }
 0x160   :  { %505 = vmatpush3.bf16.msra.mxu1 %v640_v12 }
 0x163   :  { %507 = vmatmul.mubr.bf16.vlgmr.msra.gmra.mrb[0].mxu1 %v216_v24 }
 0x236   :  { %v294_v28 = vpop.f32.mrb[0].mxu1 }
 0x237   :  { %v300_v29 = vmul.f32 0.032258064, %v294_v28  ;;  %v508_v30 = vpop.f32.mrb[1].mxu1 }
 0x238   :  { %v297_v31 = vpop.f32.mrb[2].mxu1 }
 0x239   :  { %532 = vrsqrt.f32 %v300_v29  ;;  %v509_v32 = vpop.f32.mrb[3].mxu1  ;;  %vm303_vm1 = vcmp.eq.f32.partialorder %v300_v29, inf  ;;  %v306_v35 = vand.u32 2147483648, %v300_v29  ;;  %vm305_vm2 = vcmp.eq.f32.partialorder %v300_v29, 0.0 }
 0x243   :  { %v533_v33 = vpop.eup %532 }
 0x244   :  { %v302_v34 = vmul.f32 %v533_v33, %v300_v29 }
 0x246   :  { %v304_v36 = vsel %vm303_vm1, %v300_v29, %v302_v34 }
 0x247   :  { %v307_v37 = vsel %vm305_vm2, %v306_v35, %v304_v36 }
 0x248   :  { %v309_v38 = vadd.f32 1e-06, %v307_v37 }
 0x24a   :  { %534 = vrcp.f32 %v309_v38 }
 0x254   :  { %v535_v40 = vpop.eup %534 }
 0x255   :  { %v312_v41 = vmul.f32 %v535_v40, %v311_v39 }
 0x257   :  { %v313_v43 = vmul.f32 %v312_v41, %v214_v21 }
 0x259   :  { %v316_v44 = vadd.f32 %v315_v42, %v313_v43 }
 0x25b   :  { %317 = vst [vmem:[#allocation4] sm:$0xff] %v316_v44 }
 0x262   :  { %v335_v45 = vld [vmem:[#allocation4] sm:$0xf] }
 0x263   :  { %336 = vst [vmem:[%s715_s4] sm:$0xf] %v335_v45 }

</bundles_post_ra>
